<compile_context>
chip_gen: v7x
topology: tpu7x:2x2x1
jax: 0.10.0
libtpu: 0.0.40
codegen_flags: <defaults>
</compile_context>

<pallas_src>
import math

import jax
import jax.numpy as jnp
from jax.experimental import pallas as pl
from jax.experimental.pallas import tpu as pltpu

HIDDEN = 128


def _cdiv(a, b):
    return (a + b - 1) // b


def _round_up(n, m):
    return ((n + m - 1) // m) * m


def _actor_kernel(x_ref, w1_ref, b1_ref, w2_ref, b2_ref, w3_ref, b3_ref,
                  a_max_ref, mean_ref):
    """Fused Actor MLP forward (mean head only) for one batch tile."""
    a_max = a_max_ref[0, 0]

    x = x_ref[...]

    # layer 1 + ReLU  (f32 MXU matmul, f32 accumulation)
    h1 = jnp.dot(x, w1_ref[...], preferred_element_type=jnp.float32) + b1_ref[...]
    h1 = jnp.maximum(h1, 0.0)

    # layer 2 + ReLU
    h2 = jnp.dot(h1, w2_ref[...], preferred_element_type=jnp.float32) + b2_ref[...]
    h2 = jnp.maximum(h2, 0.0)

    # layer 3 + tanh, scaled by a_max
    h3 = jnp.dot(h2, w3_ref[...], preferred_element_type=jnp.float32) + b3_ref[...]
    mean_ref[...] = (jnp.tanh(h3) * a_max).astype(mean_ref.dtype)


def actor_forward(x, params, a_max, *, block_b=1024):
    """Actor.forward: returns (mean, action_log_std, action_std), all (B, Na)."""
    w1, b1, w2, b2, w3, b3, log_std = params
    B, Ns = x.shape
    Na = w3.shape[1]

    # Batch tiling: biggest tiles that fit, but >=2 blocks when B > 8 so the
    # "parallel" batch axis can shard across both v7x TensorCores.
    nblocks = _cdiv(B, block_b)
    if nblocks == 1 and B > 8:
        nblocks = 2
    bb = _round_up(_cdiv(B, nblocks), 8)
    if bb >= B:
        bb = B                      # single full block (block dim == array dim)
    grid = _cdiv(B, bb)             # partial last block handled by Pallas

    a_max_arr = jnp.full((1, 1), a_max, jnp.float32)

    def resident(shape):  # weights / biases: same block every grid step
        return pl.BlockSpec(shape, lambda i: (0, 0))

    mean = pl.pallas_call(
        _actor_kernel,
        out_shape=jax.ShapeDtypeStruct((B, Na), jnp.float32),
        grid_spec=pltpu.PrefetchScalarGridSpec(
            num_scalar_prefetch=0,
            grid=(grid,),
            in_specs=[
                pl.BlockSpec((bb, Ns), lambda i: (i, 0)),           # x (batch-tiled)
                resident((Ns, HIDDEN)),                             # w1
                resident((1, HIDDEN)),                              # b1
                resident((HIDDEN, HIDDEN)),                         # w2
                resident((1, HIDDEN)),                              # b2
                resident((HIDDEN, Na)),                             # w3
                resident((1, Na)),                                  # b3
                pl.BlockSpec(memory_space=pltpu.MemorySpace.SMEM),  # a_max scalar
            ],
            out_specs=pl.BlockSpec((bb, Na), lambda i: (i, 0)),
        ),
        compiler_params=pltpu.CompilerParams(
            dimension_semantics=("parallel",),
            vmem_limit_bytes=32 * 1024 * 1024),
    )(x, w1, b1, w2, b2, w3, b3, a_max_arr)

    # x-independent outputs: exp once on the (1, Na) parameter, broadcast lazily.
    action_log_std = jnp.broadcast_to(log_std, mean.shape)
    action_std = jnp.broadcast_to(jnp.exp(log_std), mean.shape)
    return mean, action_log_std, action_std


def init_actor_params(key, Ns, Na, log_std=0.0):
    """Deterministic init mirroring nn.Linear defaults + the l3 scaling."""
    def linear_init(k, fan_in, fan_out):
        kw, kb = jax.random.split(k)
        bound = 1.0 / math.sqrt(fan_in)
        w = jax.random.uniform(kw, (fan_in, fan_out), jnp.float32, -bound, bound)
        b = jax.random.uniform(kb, (1, fan_out), jnp.float32, -bound, bound)
        return w, b

    k1, k2, k3 = jax.random.split(key, 3)
    w1, b1 = linear_init(k1, Ns, HIDDEN)
    w2, b2 = linear_init(k2, HIDDEN, HIDDEN)
    w3, b3 = linear_init(k3, HIDDEN, Na)
    w3 = w3 * 0.1                      # self.l3.weight.data.mul_(0.1)
    b3 = b3 * 0.0                      # self.l3.bias.data.mul_(0.0)
    action_log_std = jnp.ones((1, Na), jnp.float32) * log_std
    return (w1, b1, w2, b2, w3, b3, action_log_std)


def actor_forward_ref(x, params, a_max):
    """Pure-JAX f32 reference for correctness check."""
    w1, b1, w2, b2, w3, b3, log_std = params
    h1 = jnp.maximum(x @ w1 + b1, 0.0)
    h2 = jnp.maximum(h1 @ w2 + b2, 0.0)
    mean = jnp.tanh(h2 @ w3 + b3) * a_max
    ls = jnp.broadcast_to(log_std, mean.shape)
    return mean, ls, jnp.exp(ls)


if __name__ == "__main__":
    Ns, Na, a_max = 8, 4, 2.0
    key = jax.random.PRNGKey(0)
    kp, kx = jax.random.split(key)
    params = init_actor_params(kp, Ns, Na, log_std=0.0)

    # B=2: single full block (block dims == array dims, no padding needed).
    # B=300: forced 2-block "parallel" grid with a partial last block
    #        (exercises v7x megacore sharding + Pallas partial-block masking).
    for B in (2, 300):
        x = jax.random.normal(jax.random.fold_in(kx, B), (B, Ns), jnp.float32)

        mean, log_std_out, std_out = actor_forward(x, params, a_max)
        jax.block_until_ready((mean, log_std_out, std_out))

        mean_r, ls_r, std_r = actor_forward_ref(x, params, a_max)
        assert mean.shape == (B, Na)
        # f32 MXU matmuls: tolerance covers even a bf16-pass lowering corner case.
        assert jnp.allclose(mean, mean_r, atol=1e-2, rtol=1e-2), "mean mismatch"
        assert jnp.allclose(log_std_out, ls_r, atol=1e-6), "log_std mismatch"
        assert jnp.allclose(std_out, std_r, atol=1e-6), "std mismatch"

    print("KERNEL_OK")
</pallas_src>

<mosaic_0001>
module attributes {stable_mosaic.version = 11 : i64} {
  func.func @_actor_kernel(%arg0: i32, %arg1: memref<2x8xf32, #tpu.memory_space<vmem>>, %arg2: memref<8x128xf32, #tpu.memory_space<vmem>>, %arg3: memref<1x128xf32, #tpu.memory_space<vmem>>, %arg4: memref<128x128xf32, #tpu.memory_space<vmem>>, %arg5: memref<1x128xf32, #tpu.memory_space<vmem>>, %arg6: memref<128x4xf32, #tpu.memory_space<vmem>>, %arg7: memref<1x4xf32, #tpu.memory_space<vmem>>, %arg8: memref<1x1xf32, #tpu.memory_space<smem>>, %arg9: memref<2x4xf32, #tpu.memory_space<vmem>>) attributes {dimension_semantics = [#tpu.dimension_semantics<parallel>], iteration_bounds = array<i64: 1>, scalar_prefetch = 0 : i64, scratch_operands = 0 : i64, tpu.core_type = #tpu.core_type<tc>, window_params = [{transform_indices = @transform_0, window_bounds = array<i64: 2, 8>}, {pipeline_mode = #tpu.pipeline_mode<synchronous>, transform_indices = @transform_1, window_bounds = array<i64: 8, 128>}, {pipeline_mode = #tpu.pipeline_mode<synchronous>, transform_indices = @transform_2, window_bounds = array<i64: 1, 128>}, {pipeline_mode = #tpu.pipeline_mode<synchronous>, transform_indices = @transform_3, window_bounds = array<i64: 128, 128>}, {pipeline_mode = #tpu.pipeline_mode<synchronous>, transform_indices = @transform_4, window_bounds = array<i64: 1, 128>}, {pipeline_mode = #tpu.pipeline_mode<synchronous>, transform_indices = @transform_5, window_bounds = array<i64: 128, 4>}, {pipeline_mode = #tpu.pipeline_mode<synchronous>, transform_indices = @transform_6, window_bounds = array<i64: 1, 4>}, {transform_indices = @transform_7, window_bounds = array<i64: 1, 1>}, {transform_indices = @transform_8, window_bounds = array<i64: 2, 4>}]} {
    %c0 = arith.constant 0 : index
    %c0_0 = arith.constant 0 : index
    %0 = memref.load %arg8[%c0, %c0_0] : memref<1x1xf32, #tpu.memory_space<smem>>
    %c0_1 = arith.constant 0 : index
    %c0_2 = arith.constant 0 : index
    %1 = vector.load %arg1[%c0_1, %c0_2] : memref<2x8xf32, #tpu.memory_space<vmem>>, vector<2x8xf32>
    %c0_3 = arith.constant 0 : index
    %c0_4 = arith.constant 0 : index
    %2 = vector.load %arg2[%c0_3, %c0_4] : memref<8x128xf32, #tpu.memory_space<vmem>>, vector<8x128xf32>
    %cst = arith.constant dense<0.000000e+00> : vector<2x128xf32>
    %3 = tpu.matmul %1, %2, %cst {dimension_numbers = #tpu.dot_dimension_numbers<[1], [0], [0], [1], [0, 0, 1, 1], [], []>} : vector<2x8xf32>, vector<8x128xf32>, vector<2x128xf32> -> vector<2x128xf32>
    %c0_5 = arith.constant 0 : index
    %c0_6 = arith.constant 0 : index
    %4 = vector.load %arg3[%c0_5, %c0_6] : memref<1x128xf32, #tpu.memory_space<vmem>>, vector<1x128xf32>
    %5 = vector.broadcast %4 : vector<1x128xf32> to vector<2x128xf32>
    %6 = arith.addf %3, %5 : vector<2x128xf32>
    %cst_7 = arith.constant 0.000000e+00 : f32
    %7 = vector.broadcast %cst_7 : f32 to vector<2x128xf32>
    %8 = arith.maximumf %6, %7 : vector<2x128xf32>
    %c0_8 = arith.constant 0 : index
    %c0_9 = arith.constant 0 : index
    %9 = vector.load %arg4[%c0_8, %c0_9] : memref<128x128xf32, #tpu.memory_space<vmem>>, vector<128x128xf32>
    %cst_10 = arith.constant dense<0.000000e+00> : vector<2x128xf32>
    %10 = tpu.matmul %8, %9, %cst_10 {dimension_numbers = #tpu.dot_dimension_numbers<[1], [0], [0], [1], [0, 0, 1, 1], [], []>} : vector<2x128xf32>, vector<128x128xf32>, vector<2x128xf32> -> vector<2x128xf32>
    %c0_11 = arith.constant 0 : index
    %c0_12 = arith.constant 0 : index
    %11 = vector.load %arg5[%c0_11, %c0_12] : memref<1x128xf32, #tpu.memory_space<vmem>>, vector<1x128xf32>
    %12 = vector.broadcast %11 : vector<1x128xf32> to vector<2x128xf32>
    %13 = arith.addf %10, %12 : vector<2x128xf32>
    %cst_13 = arith.constant 0.000000e+00 : f32
    %14 = vector.broadcast %cst_13 : f32 to vector<2x128xf32>
    %15 = arith.maximumf %13, %14 : vector<2x128xf32>
    %c0_14 = arith.constant 0 : index
    %c0_15 = arith.constant 0 : index
    %16 = vector.load %arg6[%c0_14, %c0_15] : memref<128x4xf32, #tpu.memory_space<vmem>>, vector<128x4xf32>
    %cst_16 = arith.constant dense<0.000000e+00> : vector<2x4xf32>
    %17 = tpu.matmul %15, %16, %cst_16 {dimension_numbers = #tpu.dot_dimension_numbers<[1], [0], [0], [1], [0, 0, 1, 1], [], []>} : vector<2x128xf32>, vector<128x4xf32>, vector<2x4xf32> -> vector<2x4xf32>
    %c0_17 = arith.constant 0 : index
    %c0_18 = arith.constant 0 : index
    %18 = vector.load %arg7[%c0_17, %c0_18] : memref<1x4xf32, #tpu.memory_space<vmem>>, vector<1x4xf32>
    %19 = vector.broadcast %18 : vector<1x4xf32> to vector<2x4xf32>
    %20 = arith.addf %17, %19 : vector<2x4xf32>
    %21 = math.tanh %20 : vector<2x4xf32>
    %22 = vector.broadcast %0 : f32 to vector<2x4xf32>
    %23 = arith.mulf %21, %22 : vector<2x4xf32>
    %c0_19 = arith.constant 0 : index
    %c0_20 = arith.constant 0 : index
    %24 = vector.load %arg9[%c0_19, %c0_20] : memref<2x4xf32, #tpu.memory_space<vmem>>, vector<2x4xf32>
    tpu.vector_store %arg9[%c0_19, %c0_20], %23 {strides = array<i32>} : memref<2x4xf32, #tpu.memory_space<vmem>>, vector<2x4xf32>,
    return
  }
  func.func @transform_0(%arg0: i32) -> (i32, i32) {
    %c0_i32 = arith.constant 0 : i32
    %c0_i32_0 = arith.constant 0 : i32
    return %arg0, %c0_i32 : i32, i32
  }
  func.func @transform_1(%arg0: i32) -> (i32, i32) {
    %c0_i32 = arith.constant 0 : i32
    %c0_i32_0 = arith.constant 0 : i32
    %c0_i32_1 = arith.constant 0 : i32
    return %c0_i32, %c0_i32_0 : i32, i32
  }
  func.func @transform_2(%arg0: i32) -> (i32, i32) {
    %c0_i32 = arith.constant 0 : i32
    %c0_i32_0 = arith.constant 0 : i32
    %c0_i32_1 = arith.constant 0 : i32
    return %c0_i32, %c0_i32_0 : i32, i32
  }
  func.func @transform_3(%arg0: i32) -> (i32, i32) {
    %c0_i32 = arith.constant 0 : i32
    %c0_i32_0 = arith.constant 0 : i32
    %c0_i32_1 = arith.constant 0 : i32
    return %c0_i32, %c0_i32_0 : i32, i32
  }
  func.func @transform_4(%arg0: i32) -> (i32, i32) {
    %c0_i32 = arith.constant 0 : i32
    %c0_i32_0 = arith.constant 0 : i32
    %c0_i32_1 = arith.constant 0 : i32
    return %c0_i32, %c0_i32_0 : i32, i32
  }
  func.func @transform_5(%arg0: i32) -> (i32, i32) {
    %c0_i32 = arith.constant 0 : i32
    %c0_i32_0 = arith.constant 0 : i32
    %c0_i32_1 = arith.constant 0 : i32
    return %c0_i32, %c0_i32_0 : i32, i32
  }
  func.func @transform_6(%arg0: i32) -> (i32, i32) {
    %c0_i32 = arith.constant 0 : i32
    %c0_i32_0 = arith.constant 0 : i32
    %c0_i32_1 = arith.constant 0 : i32
    return %c0_i32, %c0_i32_0 : i32, i32
  }
  func.func @transform_7(%arg0: i32) -> (i32, i32) {
    %c0_i32 = arith.constant 0 : i32
    %c0_i32_0 = arith.constant 0 : i32
    %c0_i32_1 = arith.constant 0 : i32
    return %c0_i32, %c0_i32_0 : i32, i32
  }
  func.func @transform_8(%arg0: i32) -> (i32, i32) {
    %c0_i32 = arith.constant 0 : i32
    %c0_i32_0 = arith.constant 0 : i32
    return %arg0, %c0_i32 : i32, i32
  }
}

</mosaic_0001>

<bundles_post_ra>
// kernel: tpu_custom_call.1
= control target key start
LH: loop header
LB: loop body
LE: loop exit
PB: predicated region body
PF: predicated region fallthrough
CT: control target
= control target key end

     0   :  { %vm41_vm0 = vcmask 64512   ;;  %v515_v2 = vmov 0.0   ;;  %vm516_vm1 = vmmov 0   ;;  %v517_v6 = vmov 0.0|0.0   ;;  %s709_s0 = inlined_call_operand.vmem [shape: f32[2,8], index: 0, kind: input, shape index: {}]   ;;  %s710_s1 = inlined_call_operand.vmem [shape: f32[8,128], index: 1, kind: input, shape index: {}]   ;;  %s711_s2 = inlined_call_operand.vmem [shape: f32[1,128], index: 2, kind: input, shape index: {}]   ;;  %s712_s3 = inlined_call_operand.vmem [shape: f32[128,128], index: 3, kind: input, shape index: {}]   ;;  %s713_s4 = inlined_call_operand.vmem [shape: f32[1,128], index: 4, kind: input, shape index: {}]   ;;  %s714_s5 = inlined_call_operand.vmem [shape: f32[128,4], index: 5, kind: input, shape index: {}]   ;;  %s715_s6 = inlined_call_operand.vmem [shape: f32[1,4], index: 6, kind: input, shape index: {}]   ;;  %s716_s7 = inlined_call_operand.<no memory space> [shape: f32[1,1], index: 7, kind: input, shape index: {}]   ;;  %s717_s8 = inlined_call_operand.hbm [shape: f32[2,4], index: 8, kind: output, shape index: {}]  }
   0x1   :  { %v33_v0 = vld [vmem:[%s710_s1] sm:$0xff]  ;;  %362 = vmatprep.subr.mxu0 %v515_v2  ;;  %364 = vmatprep.mubr.msk.f32.mxu0 %vm516_vm1, %v515_v2  ;;  %v117_v4 = vld [vmem:[%s712_s3 + $0x8] sm:$0xff]  ;;  %v118_v5 = vld [vmem:[%s712_s3 + $0x10] sm:$0xff] }
   0x2   :  { %v32_v1 = vld [vmem:[%s709_s0] sm:$0x3]  ;;  %363 = vmatpush3.msra.mxu0 %v33_v0  ;;  %437 = vmatprep.subr.bf16.mxu1 %v517_v6  ;;  %v119_v8 = vld [vmem:[%s712_s3 + $0x18] sm:$0xff]  ;;  %v121_v11 = vld [vmem:[%s712_s3 + $0x28] sm:$0xff] }
   0x3   :  { %v116_v3 = vld [vmem:[%s712_s3] sm:$0xff]  ;;  %365 = vmatmul.mubr.msk.f32.vlgmr.msra.gmra.mrb[0].mxu0 %vm41_vm0, %v32_v1  ;;  %399 = vmatprep.mubr.msk.f32.mxu1 %vm516_vm1, %v515_v2  ;;  %v441_v9 = vpack.c.bf16 %v119_v8, %v118_v5 }
   0x4   :  { %v438_v7 = vpack.c.bf16 %v117_v4, %v116_v3  ;;  %461 = vmatprep.subr.bf16.mxu0 %v517_v6  ;;  %v120_v10 = vld [vmem:[%s712_s3 + $0x20] sm:$0xff]  ;;  %434 = vmatprep.mubr.msk.f32.mxu0 %vm516_vm1, %v515_v2 }
   0x6   :  { %439 = vmatpush3.bf16.msra.mxu1 %v438_v7 }
   0x7   :  { %440 = vmatprep.subr.bf16.mxu1 %v517_v6 }
   0x8   :  { %14 = vsyncpa [#allocation4], 0  ;;  %v444_v12 = vpack.c.bf16 %v121_v11, %v120_v10  ;;  %v122_v13 = vld [vmem:[%s712_s3 + $0x30] sm:$0xff]  ;;  %v123_v14 = vld [vmem:[%s712_s3 + $0x38] sm:$0xff]  ;;  %v304_v2 = vstv %s716_s7  ;;  %s518_s27 = smov [#allocation3]   ;;  %vm306_vm2 = vcmask 25600  }
   0x9   :  { %v447_v15 = vpack.c.bf16 %v123_v14, %v122_v13  ;;  %v124_v16 = vld [vmem:[%s712_s3 + $0x40] sm:$0xff]  ;;  %v125_v17 = vld [vmem:[%s712_s3 + $0x48] sm:$0xff]  ;;  %v126_v19 = vld [vmem:[%s712_s3 + $0x50] sm:$0xff]  ;;  %s314_s28 = sshll.u32 %s518_s27, 4  ;;  %s315_s28 = int_to_ptr.vmem [resolvable:$true] %s314_s28 }
   0xa   :  { %442 = vmatpush3.bf16.msra.mxu1 %v441_v9  ;;  %v450_v18 = vpack.c.bf16 %v125_v17, %v124_v16  ;;  %v127_v20 = vld [vmem:[%s712_s3 + $0x58] sm:$0xff]  ;;  %v128_v22 = vld [vmem:[%s712_s3 + $0x60] sm:$0xff]  ;;  %v129_v23 = vld [vmem:[%s712_s3 + $0x68] sm:$0xff]  ;;  %p496_p1 = scmp.lt.s32.totalorder %s315_s28, %s315_s28 }
   0xb   :  { %443 = vmatprep.subr.bf16.mxu1 %v517_v6  ;;  %v453_v21 = vpack.c.bf16 %v127_v20, %v126_v19  ;;  %v456_v24 = vpack.c.bf16 %v129_v23, %v128_v22  ;;  %v130_v25 = vld [vmem:[%s712_s3 + $0x70] sm:$0xff]  ;;  %v131_v26 = vld [vmem:[%s712_s3 + $0x78] sm:$0xff]  ;;  %v210_v28 = vld [vmem:[%s714_s5] sm:$0xff] }
   0xc   :  { %v459_v27 = vpack.c.bf16 %v131_v26, %v130_v25  ;;  %v211_v29 = vld [vmem:[%s714_s5 + $0x8] sm:$0xff]  ;;  %v212_v30 = vld [vmem:[%s714_s5 + $0x10] sm:$0xff]  ;;  %v213_v32 = vld [vmem:[%s714_s5 + $0x18] sm:$0xff] }
   0xd   :  { %v462_v31 = vpack.c.bf16 %v211_v29, %v210_v28  ;;  %v465_v33 = vpack.c.bf16 %v213_v32, %v212_v30  ;;  %v214_v34 = vld [vmem:[%s714_s5 + $0x20] sm:$0xff]  ;;  %v215_v35 = vld [vmem:[%s714_s5 + $0x28] sm:$0xff]  ;;  %v216_v37 = vld [vmem:[%s714_s5 + $0x30] sm:$0xff] }
   0xe   :  { %445 = vmatpush3.bf16.msra.mxu1 %v444_v12  ;;  %v468_v36 = vpack.c.bf16 %v215_v35, %v214_v34  ;;  %v217_v38 = vld [vmem:[%s714_s5 + $0x38] sm:$0xff]  ;;  %v218_v40 = vld [vmem:[%s714_s5 + $0x40] sm:$0xff]  ;;  %v219_v41 = vld [vmem:[%s714_s5 + $0x48] sm:$0xff] }
   0xf   :  { %446 = vmatprep.subr.bf16.mxu1 %v517_v6  ;;  %463 = vmatpush3.bf16.msra.mxu0 %v462_v31  ;;  %v471_v39 = vpack.c.bf16 %v217_v38, %v216_v37  ;;  %v474_v42 = vpack.c.bf16 %v219_v41, %v218_v40  ;;  %v220_v43 = vld [vmem:[%s714_s5 + $0x50] sm:$0xff]  ;;  %v221_v44 = vld [vmem:[%s714_s5 + $0x58] sm:$0xff]  ;;  %v222_v46 = vld [vmem:[%s714_s5 + $0x60] sm:$0xff] }
  0x10   :  { %464 = vmatprep.subr.bf16.mxu0 %v517_v6  ;;  %v477_v45 = vpack.c.bf16 %v221_v44, %v220_v43  ;;  %v223_v47 = vld [vmem:[%s714_s5 + $0x68] sm:$0xff]  ;;  %v322_v49 = vld [vmem:[%s711_s2] ss:$0 sm:$0xff]  ;;  %v224_v54 = vld [vmem:[%s714_s5 + $0x70] sm:$0xff] }
  0x11   :  { %v480_v48 = vpack.c.bf16 %v223_v47, %v222_v46  ;;  %v225_v55 = vld [vmem:[%s714_s5 + $0x78] sm:$0xff]  ;;  %v324_v57 = vld [vmem:[%s713_s4] ss:$0 sm:$0xff]  ;;  %s491_s4 = scalar_lea.vmem %s315_s28, 32 }
  0x12   :  { %448 = vmatpush3.bf16.msra.mxu1 %v447_v15  ;;  %v483_v56 = vpack.c.bf16 %v225_v55, %v224_v54  ;;  %v325_v62 = vld [vmem:[%s715_s6] ss:$0 sm:$0xff]  ;;  %p492_p0 = scmp.ne.s32.totalorder %s315_s28, %s491_s4  ;;  %p497_p2 = scmp.lt.s32.totalorder %s491_s4, %s491_s4 }
  0x13   :  { %449 = vmatprep.subr.bf16.mxu1 %v517_v6  ;;  %466 = vmatpush3.bf16.msra.mxu0 %v465_v33 }
  0x14   :  { %467 = vmatprep.subr.bf16.mxu0 %v517_v6  ;;  %p498_p3 = por %p497_p2, %p496_p1 }
  0x16   :  { %451 = vmatpush3.bf16.msra.mxu1 %v450_v18  ;;  %p499_p4 = pnand %p498_p3, %p492_p0 }
  0x17   :  { %452 = vmatprep.subr.bf16.mxu1 %v517_v6  ;;  %469 = vmatpush3.bf16.msra.mxu0 %v468_v36 }
  0x18   :  { %470 = vmatprep.subr.bf16.mxu0 %v517_v6 }
  0x1a   :  { %454 = vmatpush3.bf16.msra.mxu1 %v453_v21 }
  0x1b   :  { %455 = vmatprep.subr.bf16.mxu1 %v517_v6  ;;  %472 = vmatpush3.bf16.msra.mxu0 %v471_v39 }
  0x1c   :  { %473 = vmatprep.subr.bf16.mxu0 %v517_v6 }
  0x1e   :  { %457 = vmatpush3.bf16.msra.mxu1 %v456_v24 }
  0x1f   :  { %458 = vmatprep.subr.bf16.mxu1 %v517_v6  ;;  %475 = vmatpush3.bf16.msra.mxu0 %v474_v42 }
  0x20   :  { %476 = vmatprep.subr.bf16.mxu0 %v517_v6 }
  0x22   :  { %460 = vmatpush3.bf16.msra.mxu1 %v459_v27 }
  0x23   :  { %478 = vmatpush3.bf16.msra.mxu0 %v477_v45 }
  0x24   :  { %479 = vmatprep.subr.bf16.mxu0 %v517_v6 }
  0x27   :  { %481 = vmatpush3.bf16.msra.mxu0 %v480_v48 }
  0x28   :  { %482 = vmatprep.subr.bf16.mxu0 %v517_v6 }
  0x2b   :  { %484 = vmatpush3.bf16.msra.mxu0 %v483_v56 }
  0xd6   :  { %v111_v50 = vpop.f32.mrb[0].mxu0 }
  0xd7   :  { %v112_v51 = vadd.f32 %v322_v49, %v111_v50  ;;  %v366_v52 = vpop.f32.mrb[1].mxu0 }
  0xd9   :  { %v115_v53 = vmax.f32 %v112_v51, 0.0 }
  0xdb   :  { %400 = vmatmul.mubr.f32.vlgmr.msra.gmra.mrb[0].mxu1 %v115_v53 }
 0x1ae   :  { %v205_v58 = vpop.f32.mrb[0].mxu1 }
 0x1af   :  { %v206_v59 = vadd.f32 %v324_v57, %v205_v58  ;;  %v401_v60 = vpop.f32.mrb[1].mxu1 }
 0x1b1   :  { %v209_v61 = vmax.f32 %v206_v59, 0.0 }
 0x1b3   :  { %435 = vmatmul.mubr.f32.vlgmr.msra.gmra.mrb[2].mxu0 %v209_v61 }
 0x286   :  { %v299_v63 = vpop.f32.mrb[2].mxu0 }
 0x287   :  { %v300_v0 = vadd.f32 %v325_v62, %v299_v63  ;;  %v436_v1 = vpop.f32.mrb[3].mxu0 }
 0x289   :  { %489 = vtanh.f32 %v300_v0 }
 0x293   :  { %v490_v3 = vpop.eup %489 }
 0x294   :  { %v305_v4 = vmul.f32 %v490_v3, %v304_v2 }
 0x296   :  { %307 = vst.msk [vmem:[#allocation3] sm:$0x3] %vm306_vm2, %v305_v4 }
 0x297   :  { %502 = shalt.err (!%p499_p4)
}
 0x298   :  { %s503_s30 = scalar_lea.hbm %s717_s8, 32 }
 0x299   :  { %p504_p5 = scmp.ne.s32.totalorder %s717_s8, %s503_s30  ;;  %p507_p6 = scmp.lt.u32.totalorder %s503_s30, %s717_s8 }
 0x29b   :  { %p509_p7 = pnand %p507_p6, %p504_p5 }
 0x29d   :  { %512 = shalt.err (!%p509_p7)
}
 0x29e   :  { %317 = dma.vmem_to_hbm [thread:$0]  %s315_s28, 32, %s717_s8, [#allocation4]  }
 0x29f   :  { %513 = dma.done.wait [#allocation4], 32  }
 0x2a0   :  { %514 = vsyncadd [#allocation4], 4294967264 }
 0x2a1   :  { %321 = vsyncpa [#allocation4], 1 }

</bundles_post_ra>
